<compile_context>
chip_gen: v5e
topology: v5e:2x2
jax: 0.10.0
libtpu: 0.0.40
codegen_flags: <defaults>
</compile_context>

<pallas_src>
import functools

import jax
import jax.numpy as jnp
from jax.experimental import pallas as pl
from jax.experimental.pallas import tpu as pltpu


# ----------------------------------------------------------------------------
# Pass 1: per-edge message MLP.  edge_cat = [edge_h || x[src]]  (concat fused
# wrapper-side so layer 1 is a single MXU matmul).
# ----------------------------------------------------------------------------
def msg_mlp_kernel(ec_ref, w1m_ref, b1m_ref, w2m_ref, b2m_ref, m_ref):
    f32 = jnp.float32
    h = jnp.maximum(
        jnp.dot(ec_ref[...], w1m_ref[...], preferred_element_type=f32)
        + b1m_ref[...], 0.0)
    m_ref[...] = (jnp.dot(h, w2m_ref[...], preferred_element_type=f32)
                  + b2m_ref[...]).astype(m_ref.dtype)


# ----------------------------------------------------------------------------
# Pass 2: lane-packed max-scatter over destination nodes + node-update MLP.
# Grid = (node tiles [parallel], packed-edge tiles [arbitrary reduction]).
# ----------------------------------------------------------------------------
def scatter_update_kernel(dstp_ref,    # [gr, LANES] int32 packed dst ids
                          mpk_ref,     # [gr, LANES] f32   packed messages
                          x_ref,       # [tn, Fn]    dst node features
                          w1u_x_ref,   # [Fn, H]
                          w1u_r_ref,   # [M, H]
                          b1u_ref,     # [1, H]
                          w2u_ref,     # [H, O]
                          b2u_ref,     # [1, O]
                          out_ref,     # [tn, O]
                          r_acc,       # VMEM scratch [tn, LANES] running max
                          *, M, M_pad, G):
    f32 = jnp.float32
    n_i = pl.program_id(0)
    e_i = pl.program_id(1)
    tn = r_acc.shape[0]
    gr = dstp_ref.shape[0]
    neg_inf = -jnp.inf

    @pl.when(e_i == 0)
    def _():
        r_acc[...] = jnp.full(r_acc.shape, neg_inf, dtype=f32)

    # Global node id for each row of this node tile (hoisted out of the loop).
    node_ids = n_i * tn + jax.lax.broadcasted_iota(jnp.int32, (tn, 1), 0)

    # Running max over packed rows: each row holds G edges x M_pad features on
    # dense lanes, so the select/max is full-width VPU work.
    def body(g, r_run):
        dst_row = dstp_ref[pl.ds(g, 1), :]            # [1, LANES] int32
        m_row = mpk_ref[pl.ds(g, 1), :]               # [1, LANES] f32
        hit = dst_row == node_ids                     # [tn, LANES] bool
        cand = jnp.where(hit, m_row, neg_inf)         # [tn, LANES]
        return jnp.maximum(r_run, cand)

    r_acc[...] = jax.lax.fori_loop(0, gr, body, r_acc[...], unroll=True)

    @pl.when(e_i == pl.num_programs(1) - 1)
    def _():
        # Collapse the G packed groups with log2(G) roll+max steps (XLU).
        r_pk = r_acc[...]                              # [tn, LANES]
        shift = (G * M_pad) // 2
        while shift >= M_pad:
            r_pk = jnp.maximum(r_pk, pltpu.roll(r_pk, shift=shift, axis=1))
            shift //= 2
        r = r_pk[:, :M]                                # [tn, M]
        # DGL zero-fill: -inf sentinel means "no incoming edge".
        r = jnp.where(r == neg_inf, 0.0, r)

        h2 = jnp.maximum(
            jnp.dot(x_ref[...], w1u_x_ref[...], preferred_element_type=f32)
            + jnp.dot(r, w1u_r_ref[...], preferred_element_type=f32)
            + b1u_ref[...], 0.0)
        out_ref[...] = (jnp.dot(h2, w2u_ref[...], preferred_element_type=f32)
                        + b2u_ref[...]).astype(out_ref.dtype)


# ----------------------------------------------------------------------------
# Wrapper
# ----------------------------------------------------------------------------
def _round_up(a, b):
    return ((a + b - 1) // b) * b


def graph_conv(x, edge_h, src_idx, dst_idx, params):
    """x: [N, Fn] node feats; edge_h: [E, Fe]; src_idx/dst_idx: [E] int32."""
    f32 = jnp.float32
    N, Fn = x.shape
    E, Fe = edge_h.shape
    Fc = Fe + Fn
    H = params["w1m"].shape[1]
    M = params["w2m"].shape[1]
    O = params["w2u"].shape[1]

    # ---- lane-packing geometry for the message dim -------------------------
    if M <= 128:
        M_pad = max(1, int(pl.next_power_of_2(M)))     # power of two -> divides 128
        G = 128 // M_pad                               # edges packed per 128-lane row
    else:
        M_pad = _round_up(M, 128)
        G = 1
    LANES = G * M_pad                                  # 128 when M <= 128

    rows_needed = -(-E // G)                           # packed rows covering all edges
    gr = min(32, _round_up(rows_needed, 8))            # packed rows per edge grid step
    rows_pad = _round_up(rows_needed, gr)
    E_pad = rows_pad * G
    te = gr * G                                        # edges per edge grid step

    tn = min(256, _round_up(N, 8))                     # node tile
    N_pad = _round_up(N, tn)

    # ---- wrapper-side glue: gather, fuse concat, pad, lane-pack dst ids ----
    xs = jnp.take(x, src_idx, axis=0)                                  # [E, Fn]
    edge_cat = jnp.concatenate([edge_h, xs], axis=1)                   # [E, Fc]
    edge_cat = jnp.pad(edge_cat, ((0, E_pad - E), (0, 0)))
    dst_pad = jnp.pad(dst_idx.astype(jnp.int32), (0, E_pad - E),
                      constant_values=-1)              # -1 never matches a node id
    dst_packed = jnp.repeat(dst_pad, M_pad).reshape(rows_pad, LANES)
    x_pad = jnp.pad(x, ((0, N_pad - N), (0, 0)))

    w2m_p = jnp.pad(params["w2m"], ((0, 0), (0, M_pad - M)))
    b2m_p = jnp.pad(params["b2m"], ((0, 0), (0, M_pad - M)))

    # ---- pass 1: per-edge message MLP --------------------------------------
    m = pl.pallas_call(
        msg_mlp_kernel,
        out_shape=jax.ShapeDtypeStruct((E_pad, M_pad), f32),
        grid_spec=pltpu.PrefetchScalarGridSpec(
            num_scalar_prefetch=0,
            grid=(E_pad // te,),
            in_specs=[
                pl.BlockSpec((te, Fc), lambda i: (i, 0)),
                pl.BlockSpec((Fc, H), lambda i: (0, 0)),
                pl.BlockSpec((1, H), lambda i: (0, 0)),
                pl.BlockSpec((H, M_pad), lambda i: (0, 0)),
                pl.BlockSpec((1, M_pad), lambda i: (0, 0)),
            ],
            out_specs=pl.BlockSpec((te, M_pad), lambda i: (i, 0)),
        ),
        compiler_params=pltpu.CompilerParams(
            dimension_semantics=("parallel",),
            vmem_limit_bytes=32 * 1024 * 1024),
    )(edge_cat, params["w1m"], params["b1m"], w2m_p, b2m_p)

    # Lane-pack messages: [E_pad, M_pad] -> [rows_pad, 128] (row-major reshape).
    m_packed = m.reshape(rows_pad, LANES)

    # ---- pass 2: max-scatter + node-update MLP ------------------------------
    n_steps = N_pad // tn
    e_steps = rows_pad // gr
    flops = (2 * N_pad * E_pad * M_pad                  # dense select/max (VPU)
             + 2 * N_pad * (Fn + M) * H + 2 * N_pad * H * O)
    bytes_accessed = 4 * (n_steps * (dst_packed.size + m_packed.size)
                          + x_pad.size + N_pad * O)

    kernel = functools.partial(scatter_update_kernel, M=M, M_pad=M_pad, G=G)
    out = pl.pallas_call(
        kernel,
        out_shape=jax.ShapeDtypeStruct((N_pad, O), f32),
        grid_spec=pltpu.PrefetchScalarGridSpec(
            num_scalar_prefetch=0,
            grid=(n_steps, e_steps),
            in_specs=[
                pl.BlockSpec((gr, LANES), lambda n, e: (e, 0)),   # packed dst ids
                pl.BlockSpec((gr, LANES), lambda n, e: (e, 0)),   # packed messages
                pl.BlockSpec((tn, Fn), lambda n, e: (n, 0)),      # dst node feats
                pl.BlockSpec((Fn, H), lambda n, e: (0, 0)),       # weights: DMA'd once
                pl.BlockSpec((M, H), lambda n, e: (0, 0)),
                pl.BlockSpec((1, H), lambda n, e: (0, 0)),
                pl.BlockSpec((H, O), lambda n, e: (0, 0)),
                pl.BlockSpec((1, O), lambda n, e: (0, 0)),
            ],
            out_specs=pl.BlockSpec((tn, O), lambda n, e: (n, 0)),
            scratch_shapes=[pltpu.VMEM((tn, LANES), f32)],        # running max
        ),
        compiler_params=pltpu.CompilerParams(
            dimension_semantics=("parallel", "arbitrary"),
            vmem_limit_bytes=32 * 1024 * 1024),
        cost_estimate=pl.CostEstimate(flops=int(flops), transcendentals=0,
                                      bytes_accessed=int(bytes_accessed)),
    )(dst_packed, m_packed, x_pad,
      params["w1u_x"], params["w1u_r"], params["b1u"],
      params["w2u"], params["b2u"])

    return out[:N]


# ----------------------------------------------------------------------------
# Parameters (PyTorch-Linear-style init, weights stored as [in, out])
# ----------------------------------------------------------------------------
def init_params(key, num_src_feats, num_dst_feats, num_edge_feats, msg_size,
                num_out_feats, hidden=16):
    def linear(key, fan_in, fan_out):
        kw, kb = jax.random.split(key)
        bound = 1.0 / (fan_in ** 0.5)
        w = jax.random.uniform(kw, (fan_in, fan_out), jnp.float32, -bound, bound)
        b = jax.random.uniform(kb, (1, fan_out), jnp.float32, -bound, bound)
        return w, b

    k1, k2, k3, k4 = jax.random.split(key, 4)
    # msg layer-1 input order matches torch.cat([edge_h, x_src], dim=1)
    w1m, b1m = linear(k1, num_edge_feats + num_src_feats, hidden)
    w2m, b2m = linear(k2, hidden, msg_size)
    # udt layer-1 input order matches torch.cat([x_dst, r], dim=1)
    w1u, b1u = linear(k3, num_dst_feats + msg_size, hidden)
    w2u, b2u = linear(k4, hidden, num_out_feats)
    return {
        "w1m": w1m, "b1m": b1m, "w2m": w2m, "b2m": b2m,
        "w1u_x": w1u[:num_dst_feats], "w1u_r": w1u[num_dst_feats:], "b1u": b1u,
        "w2u": w2u, "b2u": b2u,
    }


def graph_conv_reference(x, edge_h, src_idx, dst_idx, params):
    """Pure-JAX reference mirroring the PyTorch/DGL forward."""
    N = x.shape[0]
    xs = x[src_idx]
    cat = jnp.concatenate([edge_h, xs], axis=1)
    h = jnp.maximum(cat @ params["w1m"] + params["b1m"], 0.0)
    m = h @ params["w2m"] + params["b2m"]
    mask = dst_idx[None, :] == jnp.arange(N)[:, None]
    masked = jnp.where(mask[:, :, None], m[None, :, :], -jnp.inf)
    r = masked.max(axis=1)
    r = jnp.where(mask.any(axis=1, keepdims=True), r, 0.0)
    h2 = jnp.maximum(x @ params["w1u_x"] + r @ params["w1u_r"]
                     + params["b1u"], 0.0)
    return h2 @ params["w2u"] + params["b2u"]


if __name__ == "__main__":
    # Small deterministic problem.
    num_nodes = 8
    num_edges = 16
    num_src_feats = num_dst_feats = 4   # graph.ndata['in_feats'] = x
    num_edge_feats = 6
    msg_size = 8
    num_out_feats = 8

    key = jax.random.PRNGKey(0)
    k_x, k_e, k_src, k_dst, k_p = jax.random.split(key, 5)

    x = jax.random.normal(k_x, (num_nodes, num_src_feats), jnp.float32)
    edge_h = jax.random.normal(k_e, (num_edges, num_edge_feats), jnp.float32)
    src_idx = jax.random.randint(k_src, (num_edges,), 0, num_nodes, jnp.int32)
    # Leave the last node without incoming edges to exercise DGL's zero-fill.
    dst_idx = jax.random.randint(k_dst, (num_edges,), 0, num_nodes - 1, jnp.int32)

    params = init_params(k_p, num_src_feats, num_dst_feats, num_edge_feats,
                         msg_size, num_out_feats)

    out = jax.block_until_ready(graph_conv(x, edge_h, src_idx, dst_idx, params))
    ref = graph_conv_reference(x, edge_h, src_idx, dst_idx, params)

    assert out.shape == (num_nodes, num_out_feats)
    assert jnp.allclose(out, ref, atol=1e-4, rtol=1e-4), "mismatch vs. reference"

    print("KERNEL_OK")
</pallas_src>

<mosaic_0001>
module attributes {stable_mosaic.version = 11 : i64} {
  func.func @msg_mlp_kernel(%arg0: i32, %arg1: memref<128x10xf32, #tpu.memory_space<vmem>>, %arg2: memref<10x16xf32, #tpu.memory_space<vmem>>, %arg3: memref<1x16xf32, #tpu.memory_space<vmem>>, %arg4: memref<16x8xf32, #tpu.memory_space<vmem>>, %arg5: memref<1x8xf32, #tpu.memory_space<vmem>>, %arg6: memref<128x8xf32, #tpu.memory_space<vmem>>) attributes {dimension_semantics = [#tpu.dimension_semantics<parallel>], iteration_bounds = array<i64: 1>, scalar_prefetch = 0 : i64, scratch_operands = 0 : i64, tpu.core_type = #tpu.core_type<tc>, window_params = [{transform_indices = @transform_0, window_bounds = array<i64: 128, 10>}, {pipeline_mode = #tpu.pipeline_mode<synchronous>, transform_indices = @transform_1, window_bounds = array<i64: 10, 16>}, {pipeline_mode = #tpu.pipeline_mode<synchronous>, transform_indices = @transform_2, window_bounds = array<i64: 1, 16>}, {pipeline_mode = #tpu.pipeline_mode<synchronous>, transform_indices = @transform_3, window_bounds = array<i64: 16, 8>}, {pipeline_mode = #tpu.pipeline_mode<synchronous>, transform_indices = @transform_4, window_bounds = array<i64: 1, 8>}, {transform_indices = @transform_5, window_bounds = array<i64: 128, 8>}]} {
    %c0 = arith.constant 0 : index
    %c0_0 = arith.constant 0 : index
    %0 = vector.load %arg1[%c0, %c0_0] : memref<128x10xf32, #tpu.memory_space<vmem>>, vector<128x10xf32>
    %c0_1 = arith.constant 0 : index
    %c0_2 = arith.constant 0 : index
    %1 = vector.load %arg2[%c0_1, %c0_2] : memref<10x16xf32, #tpu.memory_space<vmem>>, vector<10x16xf32>
    %cst = arith.constant dense<0.000000e+00> : vector<128x16xf32>
    %2 = tpu.matmul %0, %1, %cst {dimension_numbers = #tpu.dot_dimension_numbers<[1], [0], [0], [1], [0, 0, 1, 1], [], []>} : vector<128x10xf32>, vector<10x16xf32>, vector<128x16xf32> -> vector<128x16xf32>
    %c0_3 = arith.constant 0 : index
    %c0_4 = arith.constant 0 : index
    %3 = vector.load %arg3[%c0_3, %c0_4] : memref<1x16xf32, #tpu.memory_space<vmem>>, vector<1x16xf32>
    %4 = vector.broadcast %3 : vector<1x16xf32> to vector<128x16xf32>
    %5 = arith.addf %2, %4 : vector<128x16xf32>
    %cst_5 = arith.constant 0.000000e+00 : f32
    %6 = vector.broadcast %cst_5 : f32 to vector<128x16xf32>
    %7 = arith.maximumf %5, %6 : vector<128x16xf32>
    %c0_6 = arith.constant 0 : index
    %c0_7 = arith.constant 0 : index
    %8 = vector.load %arg4[%c0_6, %c0_7] : memref<16x8xf32, #tpu.memory_space<vmem>>, vector<16x8xf32>
    %cst_8 = arith.constant dense<0.000000e+00> : vector<128x8xf32>
    %9 = tpu.matmul %7, %8, %cst_8 {dimension_numbers = #tpu.dot_dimension_numbers<[1], [0], [0], [1], [0, 0, 1, 1], [], []>} : vector<128x16xf32>, vector<16x8xf32>, vector<128x8xf32> -> vector<128x8xf32>
    %c0_9 = arith.constant 0 : index
    %c0_10 = arith.constant 0 : index
    %10 = vector.load %arg5[%c0_9, %c0_10] : memref<1x8xf32, #tpu.memory_space<vmem>>, vector<1x8xf32>
    %11 = vector.broadcast %10 : vector<1x8xf32> to vector<128x8xf32>
    %12 = arith.addf %9, %11 : vector<128x8xf32>
    %c0_11 = arith.constant 0 : index
    %c0_12 = arith.constant 0 : index
    %13 = vector.load %arg6[%c0_11, %c0_12] : memref<128x8xf32, #tpu.memory_space<vmem>>, vector<128x8xf32>
    tpu.vector_store %arg6[%c0_11, %c0_12], %12 {strides = array<i32>} : memref<128x8xf32, #tpu.memory_space<vmem>>, vector<128x8xf32>,
    return
  }
  func.func @transform_0(%arg0: i32) -> (i32, i32) {
    %c0_i32 = arith.constant 0 : i32
    %c0_i32_0 = arith.constant 0 : i32
    return %arg0, %c0_i32 : i32, i32
  }
  func.func @transform_1(%arg0: i32) -> (i32, i32) {
    %c0_i32 = arith.constant 0 : i32
    %c0_i32_0 = arith.constant 0 : i32
    %c0_i32_1 = arith.constant 0 : i32
    return %c0_i32, %c0_i32_0 : i32, i32
  }
  func.func @transform_2(%arg0: i32) -> (i32, i32) {
    %c0_i32 = arith.constant 0 : i32
    %c0_i32_0 = arith.constant 0 : i32
    %c0_i32_1 = arith.constant 0 : i32
    return %c0_i32, %c0_i32_0 : i32, i32
  }
  func.func @transform_3(%arg0: i32) -> (i32, i32) {
    %c0_i32 = arith.constant 0 : i32
    %c0_i32_0 = arith.constant 0 : i32
    %c0_i32_1 = arith.constant 0 : i32
    return %c0_i32, %c0_i32_0 : i32, i32
  }
  func.func @transform_4(%arg0: i32) -> (i32, i32) {
    %c0_i32 = arith.constant 0 : i32
    %c0_i32_0 = arith.constant 0 : i32
    %c0_i32_1 = arith.constant 0 : i32
    return %c0_i32, %c0_i32_0 : i32, i32
  }
  func.func @transform_5(%arg0: i32) -> (i32, i32) {
    %c0_i32 = arith.constant 0 : i32
    %c0_i32_0 = arith.constant 0 : i32
    return %arg0, %c0_i32 : i32, i32
  }
}

</mosaic_0001>

<bundles_post_ra>
// kernel: tpu_custom_call.1
= control target key start
LH: loop header
LB: loop body
LE: loop exit
PB: predicated region body
PF: predicated region fallthrough
CT: control target
= control target key end

     0   :  { %vm91_vm0 = vcmask 1041408   ;;  %vm42_vm1 = vcmask 80896   ;;  %vm182_vm2 = vcmask 130048   ;;  %vm296_vm3 = vcmask 64512   ;;  %s566_s1 = inlined_call_operand.vmem [shape: f32[10,16], index: 1, kind: input, shape index: {}]   ;;  %s567_s0 = inlined_call_operand.vmem [shape: f32[128,10], index: 0, kind: input, shape index: {}]   ;;  %s568_s2 = inlined_call_operand.vmem [shape: f32[1,16], index: 2, kind: input, shape index: {}]   ;;  %s569_s4 = inlined_call_operand.vmem [shape: f32[1,8], index: 4, kind: input, shape index: {}]   ;;  %s570_s3 = inlined_call_operand.vmem [shape: f32[16,8], index: 3, kind: input, shape index: {}]   ;;  %s571_s5 = inlined_call_operand.vmem [shape: f32[128,8], index: 5, kind: output, shape index: {}]  }
   0x1   :  { %v37_v0 = vld [vmem:[%s566_s1 + $0x8] sm:$0x3]  ;;  %v36_v1 = vld [vmem:[%s566_s1] sm:$0xff]  ;;  %v30_v6 = vld [vmem:[%s567_s0 + $0x50] sm:$0xff] }
   0x2   :  { %350 = vmatpush.msk.msra.mxu2 %vm91_vm0, %v37_v0  ;;  %v28_v2 = vld [vmem:[%s567_s0 + $0x40] sm:$0xff]  ;;  %317 = vmatpush.msk.msra.mxu0 %vm91_vm0, %v37_v0  ;;  %v29_v4 = vld [vmem:[%s567_s0 + $0x48] sm:$0xff]  ;;  %v22_v7 = vld [vmem:[%s567_s0 + $0x10] sm:$0xff] }
   0x3   :  { %v20_v3 = vld [vmem:[%s567_s0] sm:$0xff]  ;;  %v21_v5 = vld [vmem:[%s567_s0 + $0x8] sm:$0xff]  ;;  %v31_v8 = vld [vmem:[%s567_s0 + $0x58] sm:$0xff] }
   0x4   :  { %351 = vmatpush.msra.mxu2 %v36_v1  ;;  %110 = vmatpush.msra.mxu0 %v36_v1  ;;  %v23_v9 = vld [vmem:[%s567_s0 + $0x18] sm:$0xff]  ;;  %v32_v10 = vld [vmem:[%s567_s0 + $0x60] sm:$0xff]  ;;  %v33_v12 = vld [vmem:[%s567_s0 + $0x68] sm:$0xff] }
   0x5   :  { %326 = vmatmul.msk.f32.vlgmr.msra.gmra.mxu2 %vm42_vm1, %v28_v2  ;;  %318 = vmatmul.msk.f32.vlgmr.msra.gmra.mxu0 %vm42_vm1, %v20_v3  ;;  %v24_v11 = vld [vmem:[%s567_s0 + $0x20] sm:$0xff]  ;;  %v25_v13 = vld [vmem:[%s567_s0 + $0x28] sm:$0xff]  ;;  %v34_v14 = vld [vmem:[%s567_s0 + $0x70] sm:$0xff] }
   0x6   :  { %v26_v15 = vld [vmem:[%s567_s0 + $0x30] sm:$0xff]  ;;  %v35_v16 = vld [vmem:[%s567_s0 + $0x78] sm:$0xff]  ;;  %v177_v18 = vld [vmem:[%s570_s3 + $0x8] sm:$0xff] }
   0x7   :  { %v27_v17 = vld [vmem:[%s567_s0 + $0x38] sm:$0xff]  ;;  %352 = vmatpush.msra.mxu3 %v177_v18  ;;  %245 = vmatpush.msra.mxu1 %v177_v18  ;;  %v176_v19 = vld [vmem:[%s570_s3] sm:$0xff] }
   0x8   :  { %v465_v20 = vld [vmem:[%s568_s2] ss:$0 sm:$0xff] }
   0x9   :  { %353 = vmatpush.msra.mxu3 %v176_v19  ;;  %246 = vmatpush.msra.mxu1 %v176_v19 }
   0xd   :  { %327 = vmatmul.msk.f32.gmra.mxu2 %vm42_vm1, %v29_v4  ;;  %319 = vmatmul.msk.f32.gmra.mxu0 %vm42_vm1, %v21_v5  ;;  %v355_v5 = vld [vmem:[%s569_s4] ss:$0 sm:$0xff] }
  0x15   :  { %328 = vmatmul.msk.f32.gmra.mxu2 %vm42_vm1, %v30_v6  ;;  %320 = vmatmul.msk.f32.gmra.mxu0 %vm42_vm1, %v22_v7 }
  0x1d   :  { %329 = vmatmul.msk.f32.gmra.mxu2 %vm42_vm1, %v31_v8  ;;  %321 = vmatmul.msk.f32.gmra.mxu0 %vm42_vm1, %v23_v9 }
  0x25   :  { %330 = vmatmul.msk.f32.gmra.mxu2 %vm42_vm1, %v32_v10  ;;  %322 = vmatmul.msk.f32.gmra.mxu0 %vm42_vm1, %v24_v11 }
  0x2d   :  { %331 = vmatmul.msk.f32.gmra.mxu2 %vm42_vm1, %v33_v12  ;;  %323 = vmatmul.msk.f32.gmra.mxu0 %vm42_vm1, %v25_v13 }
  0x35   :  { %332 = vmatmul.msk.f32.gmra.mxu2 %vm42_vm1, %v34_v14  ;;  %324 = vmatmul.msk.f32.gmra.mxu0 %vm42_vm1, %v26_v15 }
  0x3d   :  { %333 = vmatmul.msk.f32.gmra.mxu2 %vm42_vm1, %v35_v16  ;;  %325 = vmatmul.msk.f32.gmra.mxu0 %vm42_vm1, %v27_v17 }
  0x82   :  { %v112_v21 = vpop.f32.mrf.mxu0 }
  0x83   :  { %v113_v22 = vadd.f32 %v465_v20, %v112_v21 }
  0x85   :  { %v160_v23 = vmax.f32 %v113_v22, 0.0 }
  0x87   :  { %334 = vmatmul.msk.f32.vlgmr.msra.gmra.mxu1 %vm182_vm2, %v160_v23 }
  0x88   :  { %v136_v24 = vpop.f32.mrf.mxu2 }
  0x89   :  { %v137_v25 = vadd.f32 %v465_v20, %v136_v24 }
  0x8a   :  { %v115_v26 = vpop.f32.mrf.mxu0 }
  0x8b   :  { %v168_v27 = vmax.f32 %v137_v25, 0.0  ;;  %v116_v28 = vadd.f32 %v465_v20, %v115_v26 }
  0x8d   :  { %342 = vmatmul.msk.f32.vlgmr.msra.gmra.mxu3 %vm182_vm2, %v168_v27  ;;  %v161_v29 = vmax.f32 %v116_v28, 0.0 }
  0x8f   :  { %335 = vmatmul.msk.f32.gmra.mxu1 %vm182_vm2, %v161_v29 }
  0x90   :  { %v139_v30 = vpop.f32.mrf.mxu2 }
  0x91   :  { %v140_v31 = vadd.f32 %v465_v20, %v139_v30 }
  0x92   :  { %v118_v32 = vpop.f32.mrf.mxu0 }
  0x93   :  { %v169_v33 = vmax.f32 %v140_v31, 0.0  ;;  %v119_v34 = vadd.f32 %v465_v20, %v118_v32 }
  0x95   :  { %343 = vmatmul.msk.f32.gmra.mxu3 %vm182_vm2, %v169_v33  ;;  %v162_v35 = vmax.f32 %v119_v34, 0.0 }
  0x97   :  { %336 = vmatmul.msk.f32.gmra.mxu1 %vm182_vm2, %v162_v35 }
  0x98   :  { %v142_v36 = vpop.f32.mrf.mxu2 }
  0x99   :  { %v143_v37 = vadd.f32 %v465_v20, %v142_v36 }
  0x9a   :  { %v121_v38 = vpop.f32.mrf.mxu0 }
  0x9b   :  { %v170_v39 = vmax.f32 %v143_v37, 0.0  ;;  %v122_v40 = vadd.f32 %v465_v20, %v121_v38 }
  0x9d   :  { %344 = vmatmul.msk.f32.gmra.mxu3 %vm182_vm2, %v170_v39  ;;  %v163_v41 = vmax.f32 %v122_v40, 0.0 }
  0x9f   :  { %337 = vmatmul.msk.f32.gmra.mxu1 %vm182_vm2, %v163_v41 }
  0xa0   :  { %v145_v42 = vpop.f32.mrf.mxu2 }
  0xa1   :  { %v146_v43 = vadd.f32 %v465_v20, %v145_v42 }
  0xa2   :  { %v124_v44 = vpop.f32.mrf.mxu0 }
  0xa3   :  { %v171_v45 = vmax.f32 %v146_v43, 0.0  ;;  %v125_v46 = vadd.f32 %v465_v20, %v124_v44 }
  0xa5   :  { %345 = vmatmul.msk.f32.gmra.mxu3 %vm182_vm2, %v171_v45  ;;  %v164_v47 = vmax.f32 %v125_v46, 0.0 }
  0xa7   :  { %338 = vmatmul.msk.f32.gmra.mxu1 %vm182_vm2, %v164_v47 }
  0xa8   :  { %v148_v48 = vpop.f32.mrf.mxu2 }
  0xa9   :  { %v149_v49 = vadd.f32 %v465_v20, %v148_v48 }
  0xaa   :  { %v127_v50 = vpop.f32.mrf.mxu0 }
  0xab   :  { %v172_v51 = vmax.f32 %v149_v49, 0.0  ;;  %v128_v52 = vadd.f32 %v465_v20, %v127_v50 }
  0xad   :  { %346 = vmatmul.msk.f32.gmra.mxu3 %vm182_vm2, %v172_v51  ;;  %v165_v53 = vmax.f32 %v128_v52, 0.0 }
  0xaf   :  { %339 = vmatmul.msk.f32.gmra.mxu1 %vm182_vm2, %v165_v53 }
  0xb0   :  { %v151_v54 = vpop.f32.mrf.mxu2 }
  0xb1   :  { %v152_v55 = vadd.f32 %v465_v20, %v151_v54 }
  0xb2   :  { %v130_v56 = vpop.f32.mrf.mxu0 }
  0xb3   :  { %v173_v57 = vmax.f32 %v152_v55, 0.0  ;;  %v131_v58 = vadd.f32 %v465_v20, %v130_v56 }
  0xb5   :  { %347 = vmatmul.msk.f32.gmra.mxu3 %vm182_vm2, %v173_v57  ;;  %v166_v59 = vmax.f32 %v131_v58, 0.0 }
  0xb7   :  { %340 = vmatmul.msk.f32.gmra.mxu1 %vm182_vm2, %v166_v59 }
  0xb8   :  { %v154_v60 = vpop.f32.mrf.mxu2 }
  0xb9   :  { %v155_v61 = vadd.f32 %v465_v20, %v154_v60 }
  0xba   :  { %v133_v62 = vpop.f32.mrf.mxu0 }
  0xbb   :  { %v174_v63 = vmax.f32 %v155_v61, 0.0  ;;  %v134_v0 = vadd.f32 %v465_v20, %v133_v62 }
  0xbd   :  { %348 = vmatmul.msk.f32.gmra.mxu3 %vm182_vm2, %v174_v63  ;;  %v167_v1 = vmax.f32 %v134_v0, 0.0 }
  0xbf   :  { %341 = vmatmul.msk.f32.gmra.mxu1 %vm182_vm2, %v167_v1 }
  0xc0   :  { %v157_v2 = vpop.f32.mrf.mxu2 }
  0xc1   :  { %v158_v3 = vadd.f32 %v465_v20, %v157_v2 }
  0xc3   :  { %v175_v4 = vmax.f32 %v158_v3, 0.0 }
  0xc5   :  { %349 = vmatmul.msk.f32.gmra.mxu3 %vm182_vm2, %v175_v4 }
 0x104   :  { %v248_v6 = vpop.f32.mrf.mxu1 }
 0x105   :  { %v249_v7 = vadd.f32 %v355_v5, %v248_v6 }
 0x107   :  { %297 = vst.msk [vmem:[%s571_s5] sm:$0xff] %vm296_vm3, %v249_v7 }
 0x10c   :  { %v251_v8 = vpop.f32.mrf.mxu1 }
 0x10d   :  { %v252_v9 = vadd.f32 %v355_v5, %v251_v8 }
 0x10f   :  { %298 = vst.msk [vmem:[%s571_s5 + $0x8] sm:$0xff] %vm296_vm3, %v252_v9 }
 0x110   :  { %v272_v10 = vpop.f32.mrf.mxu3 }
 0x111   :  { %v273_v11 = vadd.f32 %v355_v5, %v272_v10 }
 0x113   :  { %305 = vst.msk [vmem:[%s571_s5 + $0x40] sm:$0xff] %vm296_vm3, %v273_v11 }
 0x114   :  { %v254_v12 = vpop.f32.mrf.mxu1 }
 0x115   :  { %v255_v13 = vadd.f32 %v355_v5, %v254_v12 }
 0x117   :  { %299 = vst.msk [vmem:[%s571_s5 + $0x10] sm:$0xff] %vm296_vm3, %v255_v13 }
 0x118   :  { %v275_v14 = vpop.f32.mrf.mxu3 }
 0x119   :  { %v276_v15 = vadd.f32 %v355_v5, %v275_v14 }
 0x11b   :  { %306 = vst.msk [vmem:[%s571_s5 + $0x48] sm:$0xff] %vm296_vm3, %v276_v15 }
 0x11c   :  { %v257_v16 = vpop.f32.mrf.mxu1 }
 0x11d   :  { %v258_v17 = vadd.f32 %v355_v5, %v257_v16 }
 0x11f   :  { %300 = vst.msk [vmem:[%s571_s5 + $0x18] sm:$0xff] %vm296_vm3, %v258_v17 }
 0x120   :  { %v278_v18 = vpop.f32.mrf.mxu3 }
 0x121   :  { %v279_v19 = vadd.f32 %v355_v5, %v278_v18 }
 0x123   :  { %307 = vst.msk [vmem:[%s571_s5 + $0x50] sm:$0xff] %vm296_vm3, %v279_v19 }
 0x124   :  { %v260_v20 = vpop.f32.mrf.mxu1 }
 0x125   :  { %v261_v21 = vadd.f32 %v355_v5, %v260_v20 }
 0x127   :  { %301 = vst.msk [vmem:[%s571_s5 + $0x20] sm:$0xff] %vm296_vm3, %v261_v21 }
 0x128   :  { %v281_v22 = vpop.f32.mrf.mxu3 }
 0x129   :  { %v282_v23 = vadd.f32 %v355_v5, %v281_v22 }
 0x12b   :  { %308 = vst.msk [vmem:[%s571_s5 + $0x58] sm:$0xff] %vm296_vm3, %v282_v23 }
 0x12c   :  { %v263_v24 = vpop.f32.mrf.mxu1 }
 0x12d   :  { %v264_v25 = vadd.f32 %v355_v5, %v263_v24 }
 0x12f   :  { %302 = vst.msk [vmem:[%s571_s5 + $0x28] sm:$0xff] %vm296_vm3, %v264_v25 }
 0x130   :  { %v284_v26 = vpop.f32.mrf.mxu3 }
 0x131   :  { %v285_v27 = vadd.f32 %v355_v5, %v284_v26 }
 0x133   :  { %309 = vst.msk [vmem:[%s571_s5 + $0x60] sm:$0xff] %vm296_vm3, %v285_v27 }
 0x134   :  { %v266_v28 = vpop.f32.mrf.mxu1 }
 0x135   :  { %v267_v29 = vadd.f32 %v355_v5, %v266_v28 }
 0x137   :  { %303 = vst.msk [vmem:[%s571_s5 + $0x30] sm:$0xff] %vm296_vm3, %v267_v29 }
 0x138   :  { %v287_v30 = vpop.f32.mrf.mxu3 }
 0x139   :  { %v288_v31 = vadd.f32 %v355_v5, %v287_v30 }
 0x13b   :  { %310 = vst.msk [vmem:[%s571_s5 + $0x68] sm:$0xff] %vm296_vm3, %v288_v31 }
 0x13c   :  { %v269_v32 = vpop.f32.mrf.mxu1 }
 0x13d   :  { %v270_v33 = vadd.f32 %v355_v5, %v269_v32 }
 0x13f   :  { %304 = vst.msk [vmem:[%s571_s5 + $0x38] sm:$0xff] %vm296_vm3, %v270_v33 }
 0x140   :  { %v290_v34 = vpop.f32.mrf.mxu3 }
 0x141   :  { %v291_v35 = vadd.f32 %v355_v5, %v290_v34 }
 0x143   :  { %311 = vst.msk [vmem:[%s571_s5 + $0x70] sm:$0xff] %vm296_vm3, %v291_v35 }
 0x148   :  { %v293_v36 = vpop.f32.mrf.mxu3 }
 0x149   :  { %v294_v37 = vadd.f32 %v355_v5, %v293_v36 }
 0x14b   :  { %312 = vst.msk [vmem:[%s571_s5 + $0x78] sm:$0xff] %vm296_vm3, %v294_v37 }

</bundles_post_ra>
